<compile_context>
chip_gen: v5e
topology: v5e:2x2
jax: 0.10.0
libtpu: 0.0.40
codegen_flags: <defaults>
</compile_context>

<pallas_src>
from functools import partial

import jax
import jax.numpy as jnp
from jax.experimental import pallas as pl
from jax.experimental.pallas import tpu as pltpu

LRELU_SLOPE = 0.2
IN_EPS = 1e-9          # eps used by the reference custom InstanceNormalization
LANE = 128             # TPU lane width
MATMUL_TILE_M = 512    # M tile for large problems (a few MiB double-buffered)
VMEM_LIMIT = 32 * 1024 * 1024  # safe on v5e/v6e (128 MiB) and v7x (64 MiB)


def _round_up(x, m):
    return ((x + m - 1) // m) * m


def _pad_axis(x, axis, target, value=0.0):
    pad = target - x.shape[axis]
    if pad == 0:
        return x
    widths = [(0, 0)] * x.ndim
    widths[axis] = (0, pad)
    return jnp.pad(x, widths, constant_values=value)


# ----------------------------- Pallas kernels ------------------------------

def _matmul_bias_act_kernel(a_ref, w_ref, b_ref, o_ref, *, act):
    """o = act(a @ w + b).  a:(TM,K) bf16, w:(K,OC) bf16, b:(1,OC) f32."""
    acc = jnp.dot(a_ref[...], w_ref[...], preferred_element_type=jnp.float32)
    acc = acc + b_ref[...]                      # epilogue stays f32 (v5e VPU)
    if act == "leaky_relu":
        acc = jnp.where(acc >= 0, acc, LRELU_SLOPE * acc)
    elif act == "sigmoid":
        acc = jax.nn.sigmoid(acc)               # exp on EUP slot
    o_ref[...] = acc.astype(o_ref.dtype)


def matmul_bias_act(a, w, b, act):
    """Tiled-over-M fused matmul.  a:(M,K) bf16, w:(K,OC) bf16, b:(1,OC) f32.

    K and OC must already be multiples of 128.  Returns (M_pad, OC) f32; caller
    slices the valid M rows.
    """
    M, K = a.shape
    K2, OC = w.shape
    assert K == K2 and K % LANE == 0 and OC % LANE == 0

    if M <= MATMUL_TILE_M:
        tile_m = _round_up(M, 16)              # bf16-friendly sublane multiple
    else:
        tile_m = MATMUL_TILE_M
    m_pad = _round_up(M, tile_m)
    a = _pad_axis(a, 0, m_pad)

    grid = (m_pad // tile_m,)
    cost = pl.CostEstimate(
        flops=2 * m_pad * K * OC,
        transcendentals=(m_pad * OC if act == "sigmoid" else 0),
        bytes_accessed=(a.size * 2 + w.size * 2 + b.size * 4 + m_pad * OC * 4),
    )
    return pl.pallas_call(
        partial(_matmul_bias_act_kernel, act=act),
        out_shape=jax.ShapeDtypeStruct((m_pad, OC), jnp.float32),
        grid=grid,
        in_specs=[
            pl.BlockSpec((tile_m, K), lambda i: (i, 0)),
            pl.BlockSpec((K, OC), lambda i: (0, 0)),
            pl.BlockSpec((1, OC), lambda i: (0, 0)),
        ],
        out_specs=pl.BlockSpec((tile_m, OC), lambda i: (i, 0)),
        compiler_params=pltpu.CompilerParams(
            dimension_semantics=("parallel",),
            vmem_limit_bytes=VMEM_LIMIT,
        ),
        cost_estimate=cost,
    )(a, w, b)


def _instnorm_lrelu_kernel(x_ref, scale_ref, shift_ref, o_ref):
    """Instance norm over the spatial axis + affine + LeakyReLU (f32).

    x block: (1, HW, 128).  Biased (population) variance, matching the classic
    CycleGAN InstanceNormalization.
    """
    x = x_ref[...]
    mean = jnp.mean(x, axis=1, keepdims=True)
    var = jnp.mean(jnp.square(x - mean), axis=1, keepdims=True)
    y = (x - mean) * jax.lax.rsqrt(var + IN_EPS)
    y = y * scale_ref[...] + shift_ref[...]
    o_ref[...] = jnp.where(y >= 0, y, LRELU_SLOPE * y).astype(o_ref.dtype)


def instnorm_lrelu(x, scale, shift):
    """x:(N, HW, C) f32 with C a multiple of 128; scale/shift:(1,1,C)."""
    N, HW, C = x.shape
    assert C % LANE == 0
    grid = (N, C // LANE)
    return pl.pallas_call(
        _instnorm_lrelu_kernel,
        out_shape=jax.ShapeDtypeStruct((N, HW, C), jnp.float32),
        grid=grid,
        in_specs=[
            pl.BlockSpec((1, HW, LANE), lambda n, c: (n, 0, c)),
            pl.BlockSpec((1, 1, LANE), lambda n, c: (0, 0, c)),
            pl.BlockSpec((1, 1, LANE), lambda n, c: (0, 0, c)),
        ],
        out_specs=pl.BlockSpec((1, HW, LANE), lambda n, c: (n, 0, c)),
        compiler_params=pltpu.CompilerParams(
            dimension_semantics=("parallel", "parallel"),
            vmem_limit_bytes=VMEM_LIMIT,
        ),
    )(x, scale, shift)


# ------------------------------ JAX glue ----------------------------------

def im2col(x_nhwc, kh, kw, stride, pad):
    """Extract conv patches; returns ((N*OH*OW, kh*kw*C), OH, OW)."""
    N, H, W, C = x_nhwc.shape
    xp = jnp.pad(x_nhwc, ((0, 0), (pad, pad), (pad, pad), (0, 0)))
    OH = (H + 2 * pad - kh) // stride + 1
    OW = (W + 2 * pad - kw) // stride + 1
    patches = []
    for i in range(kh):
        for j in range(kw):
            patches.append(
                xp[:, i:i + stride * OH:stride, j:j + stride * OW:stride, :])
    cols = jnp.concatenate(patches, axis=-1)  # (N, OH, OW, kh*kw*C)
    return cols.reshape(N * OH * OW, kh * kw * C), OH, OW


def conv_layer(x_nhwc, w_oihw, b, stride, pad, act):
    """Conv2d(kernel=4) via bf16 im2col + tiled Pallas matmul (bias/act fused)."""
    OC, IC, KH, KW = w_oihw.shape
    N = x_nhwc.shape[0]
    # TODO(synk): a tap-reduction grid (accumulating KH*KW shifted windows in a
    # VMEM scratch) would avoid the im2col duplication entirely; here the cols
    # are emitted in bf16 instead, which halves the duplicated HBM traffic.
    cols, OH, OW = im2col(x_nhwc, KH, KW, stride, pad)
    M, K = cols.shape
    k_pad = _round_up(K, LANE)
    oc_pad = _round_up(OC, LANE)

    # weight reordered to match patch layout: (KH, KW, IC, OC) -> (K, OC)
    w_mat = jnp.transpose(w_oihw, (2, 3, 1, 0)).reshape(K, OC)

    cols_p = _pad_axis(cols, 1, k_pad).astype(jnp.bfloat16)
    w_p = _pad_axis(_pad_axis(w_mat, 0, k_pad), 1, oc_pad).astype(jnp.bfloat16)
    b_p = _pad_axis(b.reshape(1, OC).astype(jnp.float32), 1, oc_pad)

    out = matmul_bias_act(cols_p, w_p, b_p, act)
    out = out[:M, :OC]
    return out.reshape(N, OH, OW, OC)


def apply_instnorm_lrelu(x_nhwc, scale, shift):
    N, OH, OW, C = x_nhwc.shape
    c_pad = _round_up(C, LANE)
    x = _pad_axis(x_nhwc.reshape(N, OH * OW, C), 2, c_pad)
    scale_p = _pad_axis(scale.reshape(1, 1, C).astype(jnp.float32), 2, c_pad)
    shift_p = _pad_axis(shift.reshape(1, 1, C).astype(jnp.float32), 2, c_pad)
    y = instnorm_lrelu(x, scale_p, shift_p)
    return y[:, :, :C].reshape(N, OH, OW, C)


# --------------------------- Parameters & model -----------------------------

def init_params(key, input_nc, ndf):
    ks = jax.random.split(key, 6)

    def conv_w(k, oc, ic):
        return jax.random.normal(k, (oc, ic, 4, 4), jnp.float32) * 0.05

    return {
        "w1": conv_w(ks[0], ndf, input_nc),
        "b1": jnp.zeros((ndf,), jnp.float32),
        "w2": conv_w(ks[1], ndf * 2, ndf),
        "b2": jnp.zeros((ndf * 2,), jnp.float32),
        "w3": conv_w(ks[2], ndf * 4, ndf * 2),
        "b3": jnp.zeros((ndf * 4,), jnp.float32),
        "w4": conv_w(ks[3], 1, ndf * 4),
        "b4": jnp.zeros((1,), jnp.float32),
        "in2_scale": jax.random.uniform(ks[4], (ndf * 2,), jnp.float32),
        "in2_shift": jnp.zeros((ndf * 2,), jnp.float32),
        "in3_scale": jax.random.uniform(ks[5], (ndf * 4,), jnp.float32),
        "in3_shift": jnp.zeros((ndf * 4,), jnp.float32),
    }


def discriminator_forward(params, x_nchw):
    x = jnp.transpose(x_nchw, (0, 2, 3, 1))  # NCHW -> NHWC

    # layer1: Conv(k4,s2,p1) + LeakyReLU(0.2)
    out = conv_layer(x, params["w1"], params["b1"], stride=2, pad=1,
                     act="leaky_relu")
    # layer2: Conv(k4,s2,p1) + InstanceNorm + LeakyReLU(0.2)
    out = conv_layer(out, params["w2"], params["b2"], stride=2, pad=1,
                     act="none")
    out = apply_instnorm_lrelu(out, params["in2_scale"], params["in2_shift"])
    # layer3: Conv(k4,s1,p1) + InstanceNorm + LeakyReLU(0.2)
    out = conv_layer(out, params["w3"], params["b3"], stride=1, pad=1,
                     act="none")
    out = apply_instnorm_lrelu(out, params["in3_scale"], params["in3_shift"])
    # layer4: Conv(k4,s1,p1) + Sigmoid
    out = conv_layer(out, params["w4"], params["b4"], stride=1, pad=1,
                     act="sigmoid")

    return jnp.transpose(out, (0, 3, 1, 2))  # NHWC -> NCHW


# --------------------------------- main -------------------------------------

if __name__ == "__main__":
    key = jax.random.PRNGKey(0)
    k_x, k_p = jax.random.split(key)

    input_nc, ndf = 3, 8
    N, H, W = 2, 16, 16
    x = jax.random.normal(k_x, (N, input_nc, H, W), jnp.float32)  # NCHW
    params = init_params(k_p, input_nc, ndf)

    fwd = jax.jit(discriminator_forward)
    out = fwd(params, x)
    jax.block_until_ready(out)

    # Expected PyTorch output shape for 16x16 input: (N, 1, 2, 2)
    assert out.shape == (N, 1, 2, 2), out.shape
    assert bool(jnp.all(jnp.isfinite(out)))
    assert bool(jnp.all((out >= 0.0) & (out <= 1.0)))  # sigmoid range
    print("KERNEL_OK")
</pallas_src>

<mosaic_0001>
module attributes {stable_mosaic.version = 11 : i64} {
  func.func @_matmul_bias_act_kernel(%arg0: i32, %arg1: memref<128x128xbf16, #tpu.memory_space<vmem>>, %arg2: memref<128x128xbf16, #tpu.memory_space<vmem>>, %arg3: memref<1x128xf32, #tpu.memory_space<vmem>>, %arg4: memref<128x128xf32, #tpu.memory_space<vmem>>) attributes {dimension_semantics = [#tpu.dimension_semantics<parallel>], iteration_bounds = array<i64: 1>, scalar_prefetch = 0 : i64, scratch_operands = 0 : i64, tpu.core_type = #tpu.core_type<tc>, window_params = [{transform_indices = @transform_0, window_bounds = array<i64: 128, 128>}, {pipeline_mode = #tpu.pipeline_mode<synchronous>, transform_indices = @transform_1, window_bounds = array<i64: 128, 128>}, {pipeline_mode = #tpu.pipeline_mode<synchronous>, transform_indices = @transform_2, window_bounds = array<i64: 1, 128>}, {transform_indices = @transform_3, window_bounds = array<i64: 128, 128>}]} {
    %c0 = arith.constant 0 : index
    %c0_0 = arith.constant 0 : index
    %0 = vector.load %arg1[%c0, %c0_0] : memref<128x128xbf16, #tpu.memory_space<vmem>>, vector<128x128xbf16>
    %c0_1 = arith.constant 0 : index
    %c0_2 = arith.constant 0 : index
    %1 = vector.load %arg2[%c0_1, %c0_2] : memref<128x128xbf16, #tpu.memory_space<vmem>>, vector<128x128xbf16>
    %cst = arith.constant dense<0.000000e+00> : vector<128x128xf32>
    %2 = tpu.matmul %0, %1, %cst {dimension_numbers = #tpu.dot_dimension_numbers<[1], [0], [0], [1], [0, 0, 1, 1], [], []>} : vector<128x128xbf16>, vector<128x128xbf16>, vector<128x128xf32> -> vector<128x128xf32>
    %c0_3 = arith.constant 0 : index
    %c0_4 = arith.constant 0 : index
    %3 = vector.load %arg3[%c0_3, %c0_4] : memref<1x128xf32, #tpu.memory_space<vmem>>, vector<1x128xf32>
    %4 = vector.broadcast %3 : vector<1x128xf32> to vector<128x128xf32>
    %5 = arith.addf %2, %4 : vector<128x128xf32>
    %cst_5 = arith.constant 0.000000e+00 : f32
    %6 = vector.broadcast %cst_5 : f32 to vector<128x128xf32>
    %7 = arith.cmpf oge, %5, %6 : vector<128x128xf32>
    %cst_6 = arith.constant 2.000000e-01 : f32
    %8 = vector.broadcast %cst_6 : f32 to vector<128x128xf32>
    %9 = arith.mulf %8, %5 : vector<128x128xf32>
    %10 = arith.select %7, %5, %9 : vector<128x128xi1>, vector<128x128xf32>
    %c0_7 = arith.constant 0 : index
    %c0_8 = arith.constant 0 : index
    %11 = vector.load %arg4[%c0_7, %c0_8] : memref<128x128xf32, #tpu.memory_space<vmem>>, vector<128x128xf32>
    tpu.vector_store %arg4[%c0_7, %c0_8], %10 {strides = array<i32>} : memref<128x128xf32, #tpu.memory_space<vmem>>, vector<128x128xf32>,
    return
  }
  func.func @transform_0(%arg0: i32) -> (i32, i32) {
    %c0_i32 = arith.constant 0 : i32
    %c0_i32_0 = arith.constant 0 : i32
    return %arg0, %c0_i32 : i32, i32
  }
  func.func @transform_1(%arg0: i32) -> (i32, i32) {
    %c0_i32 = arith.constant 0 : i32
    %c0_i32_0 = arith.constant 0 : i32
    %c0_i32_1 = arith.constant 0 : i32
    return %c0_i32, %c0_i32_0 : i32, i32
  }
  func.func @transform_2(%arg0: i32) -> (i32, i32) {
    %c0_i32 = arith.constant 0 : i32
    %c0_i32_0 = arith.constant 0 : i32
    %c0_i32_1 = arith.constant 0 : i32
    return %c0_i32, %c0_i32_0 : i32, i32
  }
  func.func @transform_3(%arg0: i32) -> (i32, i32) {
    %c0_i32 = arith.constant 0 : i32
    %c0_i32_0 = arith.constant 0 : i32
    return %arg0, %c0_i32 : i32, i32
  }
}

module attributes {stable_mosaic.version = 11 : i64} {
  func.func @_instnorm_lrelu_kernel(%arg0: i32, %arg1: i32, %arg2: memref<1x16x128xf32, #tpu.memory_space<vmem>>, %arg3: memref<1x1x128xf32, #tpu.memory_space<vmem>>, %arg4: memref<1x1x128xf32, #tpu.memory_space<vmem>>, %arg5: memref<1x16x128xf32, #tpu.memory_space<vmem>>) attributes {dimension_semantics = [#tpu.dimension_semantics<parallel>, #tpu.dimension_semantics<parallel>], iteration_bounds = array<i64: 2, 1>, scalar_prefetch = 0 : i64, scratch_operands = 0 : i64, tpu.core_type = #tpu.core_type<tc>, window_params = [{transform_indices = @transform_0, window_bounds = array<i64: 1, 16, 128>}, {transform_indices = @transform_1, window_bounds = array<i64: 1, 1, 128>}, {transform_indices = @transform_2, window_bounds = array<i64: 1, 1, 128>}, {transform_indices = @transform_3, window_bounds = array<i64: 1, 16, 128>}]} {
    %c0 = arith.constant 0 : index
    %c0_0 = arith.constant 0 : index
    %c0_1 = arith.constant 0 : index
    %0 = vector.load %arg2[%c0, %c0_0, %c0_1] : memref<1x16x128xf32, #tpu.memory_space<vmem>>, vector<1x16x128xf32>
    %cst = arith.constant dense<0.000000e+00> : vector<1x128xf32>
    %1 = vector.multi_reduction <add>, %0, %cst [1] : vector<1x16x128xf32> to vector<1x128xf32>
    %2 = vector.shape_cast %1 : vector<1x128xf32> to vector<1x1x128xf32>
    %cst_2 = arith.constant 1.600000e+01 : f32
    %3 = vector.broadcast %cst_2 : f32 to vector<1x1x128xf32>
    %4 = arith.divf %2, %3 : vector<1x1x128xf32>
    %5 = vector.broadcast %4 : vector<1x1x128xf32> to vector<1x16x128xf32>
    %6 = arith.subf %0, %5 : vector<1x16x128xf32>
    %7 = arith.mulf %6, %6 : vector<1x16x128xf32>
    %cst_3 = arith.constant dense<0.000000e+00> : vector<1x128xf32>
    %8 = vector.multi_reduction <add>, %7, %cst_3 [1] : vector<1x16x128xf32> to vector<1x128xf32>
    %9 = vector.shape_cast %8 : vector<1x128xf32> to vector<1x1x128xf32>
    %cst_4 = arith.constant 1.600000e+01 : f32
    %10 = vector.broadcast %cst_4 : f32 to vector<1x1x128xf32>
    %11 = arith.divf %9, %10 : vector<1x1x128xf32>
    %12 = vector.broadcast %4 : vector<1x1x128xf32> to vector<1x16x128xf32>
    %13 = arith.subf %0, %12 : vector<1x16x128xf32>
    %cst_5 = arith.constant 9.99999971E-10 : f32
    %14 = vector.broadcast %cst_5 : f32 to vector<1x1x128xf32>
    %15 = arith.addf %11, %14 : vector<1x1x128xf32>
    %16 = math.rsqrt %15 : vector<1x1x128xf32>
    %17 = vector.broadcast %16 : vector<1x1x128xf32> to vector<1x16x128xf32>
    %18 = arith.mulf %13, %17 : vector<1x16x128xf32>
    %c0_6 = arith.constant 0 : index
    %c0_7 = arith.constant 0 : index
    %c0_8 = arith.constant 0 : index
    %19 = vector.load %arg3[%c0_6, %c0_7, %c0_8] : memref<1x1x128xf32, #tpu.memory_space<vmem>>, vector<1x1x128xf32>
    %20 = vector.broadcast %19 : vector<1x1x128xf32> to vector<1x16x128xf32>
    %21 = arith.mulf %18, %20 : vector<1x16x128xf32>
    %c0_9 = arith.constant 0 : index
    %c0_10 = arith.constant 0 : index
    %c0_11 = arith.constant 0 : index
    %22 = vector.load %arg4[%c0_9, %c0_10, %c0_11] : memref<1x1x128xf32, #tpu.memory_space<vmem>>, vector<1x1x128xf32>
    %23 = vector.broadcast %22 : vector<1x1x128xf32> to vector<1x16x128xf32>
    %24 = arith.addf %21, %23 : vector<1x16x128xf32>
    %cst_12 = arith.constant 0.000000e+00 : f32
    %25 = vector.broadcast %cst_12 : f32 to vector<1x16x128xf32>
    %26 = arith.cmpf oge, %24, %25 : vector<1x16x128xf32>
    %cst_13 = arith.constant 2.000000e-01 : f32
    %27 = vector.broadcast %cst_13 : f32 to vector<1x16x128xf32>
    %28 = arith.mulf %27, %24 : vector<1x16x128xf32>
    %29 = arith.select %26, %24, %28 : vector<1x16x128xi1>, vector<1x16x128xf32>
    %c0_14 = arith.constant 0 : index
    %c0_15 = arith.constant 0 : index
    %c0_16 = arith.constant 0 : index
    %30 = vector.load %arg5[%c0_14, %c0_15, %c0_16] : memref<1x16x128xf32, #tpu.memory_space<vmem>>, vector<1x16x128xf32>
    tpu.vector_store %arg5[%c0_14, %c0_15, %c0_16], %29 {strides = array<i32>} : memref<1x16x128xf32, #tpu.memory_space<vmem>>, vector<1x16x128xf32>,
    return
  }
  func.func @transform_0(%arg0: i32, %arg1: i32) -> (i32, i32, i32) {
    %c0_i32 = arith.constant 0 : i32
    %c0_i32_0 = arith.constant 0 : i32
    return %arg0, %c0_i32, %arg1 : i32, i32, i32
  }
  func.func @transform_1(%arg0: i32, %arg1: i32) -> (i32, i32, i32) {
    %c0_i32 = arith.constant 0 : i32
    %c0_i32_0 = arith.constant 0 : i32
    %c0_i32_1 = arith.constant 0 : i32
    return %c0_i32, %c0_i32_0, %arg1 : i32, i32, i32
  }
  func.func @transform_2(%arg0: i32, %arg1: i32) -> (i32, i32, i32) {
    %c0_i32 = arith.constant 0 : i32
    %c0_i32_0 = arith.constant 0 : i32
    %c0_i32_1 = arith.constant 0 : i32
    return %c0_i32, %c0_i32_0, %arg1 : i32, i32, i32
  }
  func.func @transform_3(%arg0: i32, %arg1: i32) -> (i32, i32, i32) {
    %c0_i32 = arith.constant 0 : i32
    %c0_i32_0 = arith.constant 0 : i32
    return %arg0, %c0_i32, %arg1 : i32, i32, i32
  }
}

module attributes {stable_mosaic.version = 11 : i64} {
  func.func @_matmul_bias_act_kernel(%arg0: i32, %arg1: memref<32x128xbf16, #tpu.memory_space<vmem>>, %arg2: memref<128x128xbf16, #tpu.memory_space<vmem>>, %arg3: memref<1x128xf32, #tpu.memory_space<vmem>>, %arg4: memref<32x128xf32, #tpu.memory_space<vmem>>) attributes {dimension_semantics = [#tpu.dimension_semantics<parallel>], iteration_bounds = array<i64: 1>, scalar_prefetch = 0 : i64, scratch_operands = 0 : i64, tpu.core_type = #tpu.core_type<tc>, window_params = [{transform_indices = @transform_0, window_bounds = array<i64: 32, 128>}, {pipeline_mode = #tpu.pipeline_mode<synchronous>, transform_indices = @transform_1, window_bounds = array<i64: 128, 128>}, {pipeline_mode = #tpu.pipeline_mode<synchronous>, transform_indices = @transform_2, window_bounds = array<i64: 1, 128>}, {transform_indices = @transform_3, window_bounds = array<i64: 32, 128>}]} {
    %c0 = arith.constant 0 : index
    %c0_0 = arith.constant 0 : index
    %0 = vector.load %arg1[%c0, %c0_0] : memref<32x128xbf16, #tpu.memory_space<vmem>>, vector<32x128xbf16>
    %c0_1 = arith.constant 0 : index
    %c0_2 = arith.constant 0 : index
    %1 = vector.load %arg2[%c0_1, %c0_2] : memref<128x128xbf16, #tpu.memory_space<vmem>>, vector<128x128xbf16>
    %cst = arith.constant dense<0.000000e+00> : vector<32x128xf32>
    %2 = tpu.matmul %0, %1, %cst {dimension_numbers = #tpu.dot_dimension_numbers<[1], [0], [0], [1], [0, 0, 1, 1], [], []>} : vector<32x128xbf16>, vector<128x128xbf16>, vector<32x128xf32> -> vector<32x128xf32>
    %c0_3 = arith.constant 0 : index
    %c0_4 = arith.constant 0 : index
    %3 = vector.load %arg3[%c0_3, %c0_4] : memref<1x128xf32, #tpu.memory_space<vmem>>, vector<1x128xf32>
    %4 = vector.broadcast %3 : vector<1x128xf32> to vector<32x128xf32>
    %5 = arith.addf %2, %4 : vector<32x128xf32>
    %c0_5 = arith.constant 0 : index
    %c0_6 = arith.constant 0 : index
    %6 = vector.load %arg4[%c0_5, %c0_6] : memref<32x128xf32, #tpu.memory_space<vmem>>, vector<32x128xf32>
    tpu.vector_store %arg4[%c0_5, %c0_6], %5 {strides = array<i32>} : memref<32x128xf32, #tpu.memory_space<vmem>>, vector<32x128xf32>,
    return
  }
  func.func @transform_0(%arg0: i32) -> (i32, i32) {
    %c0_i32 = arith.constant 0 : i32
    %c0_i32_0 = arith.constant 0 : i32
    return %arg0, %c0_i32 : i32, i32
  }
  func.func @transform_1(%arg0: i32) -> (i32, i32) {
    %c0_i32 = arith.constant 0 : i32
    %c0_i32_0 = arith.constant 0 : i32
    %c0_i32_1 = arith.constant 0 : i32
    return %c0_i32, %c0_i32_0 : i32, i32
  }
  func.func @transform_2(%arg0: i32) -> (i32, i32) {
    %c0_i32 = arith.constant 0 : i32
    %c0_i32_0 = arith.constant 0 : i32
    %c0_i32_1 = arith.constant 0 : i32
    return %c0_i32, %c0_i32_0 : i32, i32
  }
  func.func @transform_3(%arg0: i32) -> (i32, i32) {
    %c0_i32 = arith.constant 0 : i32
    %c0_i32_0 = arith.constant 0 : i32
    return %arg0, %c0_i32 : i32, i32
  }
}

module attributes {stable_mosaic.version = 11 : i64} {
  func.func @_matmul_bias_act_kernel(%arg0: i32, %arg1: memref<32x256xbf16, #tpu.memory_space<vmem>>, %arg2: memref<256x128xbf16, #tpu.memory_space<vmem>>, %arg3: memref<1x128xf32, #tpu.memory_space<vmem>>, %arg4: memref<32x128xf32, #tpu.memory_space<vmem>>) attributes {dimension_semantics = [#tpu.dimension_semantics<parallel>], iteration_bounds = array<i64: 1>, scalar_prefetch = 0 : i64, scratch_operands = 0 : i64, tpu.core_type = #tpu.core_type<tc>, window_params = [{transform_indices = @transform_0, window_bounds = array<i64: 32, 256>}, {pipeline_mode = #tpu.pipeline_mode<synchronous>, transform_indices = @transform_1, window_bounds = array<i64: 256, 128>}, {pipeline_mode = #tpu.pipeline_mode<synchronous>, transform_indices = @transform_2, window_bounds = array<i64: 1, 128>}, {transform_indices = @transform_3, window_bounds = array<i64: 32, 128>}]} {
    %c0 = arith.constant 0 : index
    %c0_0 = arith.constant 0 : index
    %0 = vector.load %arg1[%c0, %c0_0] : memref<32x256xbf16, #tpu.memory_space<vmem>>, vector<32x256xbf16>
    %c0_1 = arith.constant 0 : index
    %c0_2 = arith.constant 0 : index
    %1 = vector.load %arg2[%c0_1, %c0_2] : memref<256x128xbf16, #tpu.memory_space<vmem>>, vector<256x128xbf16>
    %cst = arith.constant dense<0.000000e+00> : vector<32x128xf32>
    %2 = tpu.matmul %0, %1, %cst {dimension_numbers = #tpu.dot_dimension_numbers<[1], [0], [0], [1], [0, 0, 1, 1], [], []>} : vector<32x256xbf16>, vector<256x128xbf16>, vector<32x128xf32> -> vector<32x128xf32>
    %c0_3 = arith.constant 0 : index
    %c0_4 = arith.constant 0 : index
    %3 = vector.load %arg3[%c0_3, %c0_4] : memref<1x128xf32, #tpu.memory_space<vmem>>, vector<1x128xf32>
    %4 = vector.broadcast %3 : vector<1x128xf32> to vector<32x128xf32>
    %5 = arith.addf %2, %4 : vector<32x128xf32>
    %c0_5 = arith.constant 0 : index
    %c0_6 = arith.constant 0 : index
    %6 = vector.load %arg4[%c0_5, %c0_6] : memref<32x128xf32, #tpu.memory_space<vmem>>, vector<32x128xf32>
    tpu.vector_store %arg4[%c0_5, %c0_6], %5 {strides = array<i32>} : memref<32x128xf32, #tpu.memory_space<vmem>>, vector<32x128xf32>,
    return
  }
  func.func @transform_0(%arg0: i32) -> (i32, i32) {
    %c0_i32 = arith.constant 0 : i32
    %c0_i32_0 = arith.constant 0 : i32
    return %arg0, %c0_i32 : i32, i32
  }
  func.func @transform_1(%arg0: i32) -> (i32, i32) {
    %c0_i32 = arith.constant 0 : i32
    %c0_i32_0 = arith.constant 0 : i32
    %c0_i32_1 = arith.constant 0 : i32
    return %c0_i32, %c0_i32_0 : i32, i32
  }
  func.func @transform_2(%arg0: i32) -> (i32, i32) {
    %c0_i32 = arith.constant 0 : i32
    %c0_i32_0 = arith.constant 0 : i32
    %c0_i32_1 = arith.constant 0 : i32
    return %c0_i32, %c0_i32_0 : i32, i32
  }
  func.func @transform_3(%arg0: i32) -> (i32, i32) {
    %c0_i32 = arith.constant 0 : i32
    %c0_i32_0 = arith.constant 0 : i32
    return %arg0, %c0_i32 : i32, i32
  }
}

module attributes {stable_mosaic.version = 11 : i64} {
  func.func @_instnorm_lrelu_kernel(%arg0: i32, %arg1: i32, %arg2: memref<1x9x128xf32, #tpu.memory_space<vmem>>, %arg3: memref<1x1x128xf32, #tpu.memory_space<vmem>>, %arg4: memref<1x1x128xf32, #tpu.memory_space<vmem>>, %arg5: memref<1x9x128xf32, #tpu.memory_space<vmem>>) attributes {dimension_semantics = [#tpu.dimension_semantics<parallel>, #tpu.dimension_semantics<parallel>], iteration_bounds = array<i64: 2, 1>, scalar_prefetch = 0 : i64, scratch_operands = 0 : i64, tpu.core_type = #tpu.core_type<tc>, window_params = [{transform_indices = @transform_0, window_bounds = array<i64: 1, 9, 128>}, {transform_indices = @transform_1, window_bounds = array<i64: 1, 1, 128>}, {transform_indices = @transform_2, window_bounds = array<i64: 1, 1, 128>}, {transform_indices = @transform_3, window_bounds = array<i64: 1, 9, 128>}]} {
    %c0 = arith.constant 0 : index
    %c0_0 = arith.constant 0 : index
    %c0_1 = arith.constant 0 : index
    %0 = vector.load %arg2[%c0, %c0_0, %c0_1] : memref<1x9x128xf32, #tpu.memory_space<vmem>>, vector<1x9x128xf32>
    %cst = arith.constant dense<0.000000e+00> : vector<1x128xf32>
    %1 = vector.multi_reduction <add>, %0, %cst [1] : vector<1x9x128xf32> to vector<1x128xf32>
    %2 = vector.shape_cast %1 : vector<1x128xf32> to vector<1x1x128xf32>
    %cst_2 = arith.constant 9.000000e+00 : f32
    %3 = vector.broadcast %cst_2 : f32 to vector<1x1x128xf32>
    %4 = arith.divf %2, %3 : vector<1x1x128xf32>
    %5 = vector.broadcast %4 : vector<1x1x128xf32> to vector<1x9x128xf32>
    %6 = arith.subf %0, %5 : vector<1x9x128xf32>
    %7 = arith.mulf %6, %6 : vector<1x9x128xf32>
    %cst_3 = arith.constant dense<0.000000e+00> : vector<1x128xf32>
    %8 = vector.multi_reduction <add>, %7, %cst_3 [1] : vector<1x9x128xf32> to vector<1x128xf32>
    %9 = vector.shape_cast %8 : vector<1x128xf32> to vector<1x1x128xf32>
    %cst_4 = arith.constant 9.000000e+00 : f32
    %10 = vector.broadcast %cst_4 : f32 to vector<1x1x128xf32>
    %11 = arith.divf %9, %10 : vector<1x1x128xf32>
    %12 = vector.broadcast %4 : vector<1x1x128xf32> to vector<1x9x128xf32>
    %13 = arith.subf %0, %12 : vector<1x9x128xf32>
    %cst_5 = arith.constant 9.99999971E-10 : f32
    %14 = vector.broadcast %cst_5 : f32 to vector<1x1x128xf32>
    %15 = arith.addf %11, %14 : vector<1x1x128xf32>
    %16 = math.rsqrt %15 : vector<1x1x128xf32>
    %17 = vector.broadcast %16 : vector<1x1x128xf32> to vector<1x9x128xf32>
    %18 = arith.mulf %13, %17 : vector<1x9x128xf32>
    %c0_6 = arith.constant 0 : index
    %c0_7 = arith.constant 0 : index
    %c0_8 = arith.constant 0 : index
    %19 = vector.load %arg3[%c0_6, %c0_7, %c0_8] : memref<1x1x128xf32, #tpu.memory_space<vmem>>, vector<1x1x128xf32>
    %20 = vector.broadcast %19 : vector<1x1x128xf32> to vector<1x9x128xf32>
    %21 = arith.mulf %18, %20 : vector<1x9x128xf32>
    %c0_9 = arith.constant 0 : index
    %c0_10 = arith.constant 0 : index
    %c0_11 = arith.constant 0 : index
    %22 = vector.load %arg4[%c0_9, %c0_10, %c0_11] : memref<1x1x128xf32, #tpu.memory_space<vmem>>, vector<1x1x128xf32>
    %23 = vector.broadcast %22 : vector<1x1x128xf32> to vector<1x9x128xf32>
    %24 = arith.addf %21, %23 : vector<1x9x128xf32>
    %cst_12 = arith.constant 0.000000e+00 : f32
    %25 = vector.broadcast %cst_12 : f32 to vector<1x9x128xf32>
    %26 = arith.cmpf oge, %24, %25 : vector<1x9x128xf32>
    %cst_13 = arith.constant 2.000000e-01 : f32
    %27 = vector.broadcast %cst_13 : f32 to vector<1x9x128xf32>
    %28 = arith.mulf %27, %24 : vector<1x9x128xf32>
    %29 = arith.select %26, %24, %28 : vector<1x9x128xi1>, vector<1x9x128xf32>
    %c0_14 = arith.constant 0 : index
    %c0_15 = arith.constant 0 : index
    %c0_16 = arith.constant 0 : index
    %30 = vector.load %arg5[%c0_14, %c0_15, %c0_16] : memref<1x9x128xf32, #tpu.memory_space<vmem>>, vector<1x9x128xf32>
    tpu.vector_store %arg5[%c0_14, %c0_15, %c0_16], %29 {strides = array<i32>} : memref<1x9x128xf32, #tpu.memory_space<vmem>>, vector<1x9x128xf32>,
    return
  }
  func.func @transform_0(%arg0: i32, %arg1: i32) -> (i32, i32, i32) {
    %c0_i32 = arith.constant 0 : i32
    %c0_i32_0 = arith.constant 0 : i32
    return %arg0, %c0_i32, %arg1 : i32, i32, i32
  }
  func.func @transform_1(%arg0: i32, %arg1: i32) -> (i32, i32, i32) {
    %c0_i32 = arith.constant 0 : i32
    %c0_i32_0 = arith.constant 0 : i32
    %c0_i32_1 = arith.constant 0 : i32
    return %c0_i32, %c0_i32_0, %arg1 : i32, i32, i32
  }
  func.func @transform_2(%arg0: i32, %arg1: i32) -> (i32, i32, i32) {
    %c0_i32 = arith.constant 0 : i32
    %c0_i32_0 = arith.constant 0 : i32
    %c0_i32_1 = arith.constant 0 : i32
    return %c0_i32, %c0_i32_0, %arg1 : i32, i32, i32
  }
  func.func @transform_3(%arg0: i32, %arg1: i32) -> (i32, i32, i32) {
    %c0_i32 = arith.constant 0 : i32
    %c0_i32_0 = arith.constant 0 : i32
    return %arg0, %c0_i32, %arg1 : i32, i32, i32
  }
}

module attributes {stable_mosaic.version = 11 : i64} {
  func.func @_matmul_bias_act_kernel(%arg0: i32, %arg1: memref<16x512xbf16, #tpu.memory_space<vmem>>, %arg2: memref<512x128xbf16, #tpu.memory_space<vmem>>, %arg3: memref<1x128xf32, #tpu.memory_space<vmem>>, %arg4: memref<16x128xf32, #tpu.memory_space<vmem>>) attributes {dimension_semantics = [#tpu.dimension_semantics<parallel>], iteration_bounds = array<i64: 1>, scalar_prefetch = 0 : i64, scratch_operands = 0 : i64, tpu.core_type = #tpu.core_type<tc>, window_params = [{transform_indices = @transform_0, window_bounds = array<i64: 16, 512>}, {pipeline_mode = #tpu.pipeline_mode<synchronous>, transform_indices = @transform_1, window_bounds = array<i64: 512, 128>}, {pipeline_mode = #tpu.pipeline_mode<synchronous>, transform_indices = @transform_2, window_bounds = array<i64: 1, 128>}, {transform_indices = @transform_3, window_bounds = array<i64: 16, 128>}]} {
    %c0 = arith.constant 0 : index
    %c0_0 = arith.constant 0 : index
    %0 = vector.load %arg1[%c0, %c0_0] : memref<16x512xbf16, #tpu.memory_space<vmem>>, vector<16x512xbf16>
    %c0_1 = arith.constant 0 : index
    %c0_2 = arith.constant 0 : index
    %1 = vector.load %arg2[%c0_1, %c0_2] : memref<512x128xbf16, #tpu.memory_space<vmem>>, vector<512x128xbf16>
    %cst = arith.constant dense<0.000000e+00> : vector<16x128xf32>
    %2 = tpu.matmul %0, %1, %cst {dimension_numbers = #tpu.dot_dimension_numbers<[1], [0], [0], [1], [0, 0, 1, 1], [], []>} : vector<16x512xbf16>, vector<512x128xbf16>, vector<16x128xf32> -> vector<16x128xf32>
    %c0_3 = arith.constant 0 : index
    %c0_4 = arith.constant 0 : index
    %3 = vector.load %arg3[%c0_3, %c0_4] : memref<1x128xf32, #tpu.memory_space<vmem>>, vector<1x128xf32>
    %4 = vector.broadcast %3 : vector<1x128xf32> to vector<16x128xf32>
    %5 = arith.addf %2, %4 : vector<16x128xf32>
    %6 = arith.negf %5 : vector<16x128xf32>
    %7 = math.exp %6 : vector<16x128xf32>
    %cst_5 = arith.constant 1.000000e+00 : f32
    %8 = vector.broadcast %cst_5 : f32 to vector<16x128xf32>
    %9 = arith.addf %8, %7 : vector<16x128xf32>
    %10 = arith.divf %8, %9 : vector<16x128xf32>
    %c0_6 = arith.constant 0 : index
    %c0_7 = arith.constant 0 : index
    %11 = vector.load %arg4[%c0_6, %c0_7] : memref<16x128xf32, #tpu.memory_space<vmem>>, vector<16x128xf32>
    tpu.vector_store %arg4[%c0_6, %c0_7], %10 {strides = array<i32>} : memref<16x128xf32, #tpu.memory_space<vmem>>, vector<16x128xf32>,
    return
  }
  func.func @transform_0(%arg0: i32) -> (i32, i32) {
    %c0_i32 = arith.constant 0 : i32
    %c0_i32_0 = arith.constant 0 : i32
    return %arg0, %c0_i32 : i32, i32
  }
  func.func @transform_1(%arg0: i32) -> (i32, i32) {
    %c0_i32 = arith.constant 0 : i32
    %c0_i32_0 = arith.constant 0 : i32
    %c0_i32_1 = arith.constant 0 : i32
    return %c0_i32, %c0_i32_0 : i32, i32
  }
  func.func @transform_2(%arg0: i32) -> (i32, i32) {
    %c0_i32 = arith.constant 0 : i32
    %c0_i32_0 = arith.constant 0 : i32
    %c0_i32_1 = arith.constant 0 : i32
    return %c0_i32, %c0_i32_0 : i32, i32
  }
  func.func @transform_3(%arg0: i32) -> (i32, i32) {
    %c0_i32 = arith.constant 0 : i32
    %c0_i32_0 = arith.constant 0 : i32
    return %arg0, %c0_i32 : i32, i32
  }
}

</mosaic_0001>

<bundles_post_ra>
// kernel: discriminator_forward.6
= control target key start
LH: loop header
LB: loop body
LE: loop exit
PB: predicated region body
PF: predicated region fallthrough
CT: control target
= control target key end

     0   :  { %s505_s1 = inlined_call_operand.vmem [shape: bf16[128,128], index: 1, kind: input, shape index: {}]   ;;  %s506_s2 = inlined_call_operand.vmem [shape: f32[1,128], index: 2, kind: input, shape index: {}]   ;;  %s507_s0 = inlined_call_operand.vmem [shape: bf16[128,128], index: 0, kind: input, shape index: {}]   ;;  %s508_s3 = inlined_call_operand.vmem [shape: f32[128,128], index: 3, kind: output, shape index: {}]  }
   0x1   :  { %v342_v0 = vld [vmem:[%s505_s1 + $0x38] sm:$0xff]  ;;  %v341_v1 = vld [vmem:[%s505_s1 + $0x30] sm:$0xff]  ;;  %v340_v2 = vld [vmem:[%s505_s1 + $0x28] sm:$0xff] }
   0x2   :  { %146 = vmatpush.bf16.msra.mxu0 %v342_v0  ;;  %343 = vmatpush.bf16.msra.mxu1 %v342_v0  ;;  %v339_v3 = vld [vmem:[%s505_s1 + $0x20] sm:$0xff]  ;;  %v338_v4 = vld [vmem:[%s505_s1 + $0x18] sm:$0xff]  ;;  %v337_v5 = vld [vmem:[%s505_s1 + $0x10] sm:$0xff] }
   0x3   :  { %344 = vmatpush.bf16.msra.mxu2 %v342_v0  ;;  %345 = vmatpush.bf16.msra.mxu3 %v342_v0  ;;  %v336_v6 = vld [vmem:[%s505_s1 + $0x8] sm:$0xff]  ;;  %v335_v7 = vld [vmem:[%s505_s1] sm:$0xff]  ;;  %v329_v9 = vld [vmem:[%s507_s0 + $0x10] sm:$0xff] }
   0x4   :  { %v327_v8 = vld [vmem:[%s507_s0] sm:$0xff]  ;;  %v333_v11 = vld [vmem:[%s507_s0 + $0x30] sm:$0xff]  ;;  %v328_v12 = vld [vmem:[%s507_s0 + $0x8] sm:$0xff] }
   0x5   :  { %v331_v10 = vld [vmem:[%s507_s0 + $0x20] sm:$0xff]  ;;  %v330_v13 = vld [vmem:[%s507_s0 + $0x18] sm:$0xff]  ;;  %v332_v14 = vld [vmem:[%s507_s0 + $0x28] sm:$0xff] }
   0x6   :  { %147 = vmatpush.bf16.msra.mxu0 %v341_v1  ;;  %346 = vmatpush.bf16.msra.mxu1 %v341_v1  ;;  %v334_v15 = vld [vmem:[%s507_s0 + $0x38] sm:$0xff]  ;;  %v439_v16 = vld [vmem:[%s506_s2] ss:$0 sm:$0xff] }
   0x7   :  { %347 = vmatpush.bf16.msra.mxu2 %v341_v1  ;;  %348 = vmatpush.bf16.msra.mxu3 %v341_v1 }
   0xa   :  { %148 = vmatpush.bf16.msra.mxu0 %v340_v2  ;;  %349 = vmatpush.bf16.msra.mxu1 %v340_v2 }
   0xb   :  { %350 = vmatpush.bf16.msra.mxu2 %v340_v2  ;;  %351 = vmatpush.bf16.msra.mxu3 %v340_v2 }
   0xe   :  { %149 = vmatpush.bf16.msra.mxu0 %v339_v3  ;;  %352 = vmatpush.bf16.msra.mxu1 %v339_v3 }
   0xf   :  { %353 = vmatpush.bf16.msra.mxu2 %v339_v3  ;;  %354 = vmatpush.bf16.msra.mxu3 %v339_v3 }
  0x12   :  { %150 = vmatpush.bf16.msra.mxu0 %v338_v4  ;;  %355 = vmatpush.bf16.msra.mxu1 %v338_v4 }
  0x13   :  { %356 = vmatpush.bf16.msra.mxu2 %v338_v4  ;;  %357 = vmatpush.bf16.msra.mxu3 %v338_v4 }
  0x16   :  { %151 = vmatpush.bf16.msra.mxu0 %v337_v5  ;;  %358 = vmatpush.bf16.msra.mxu1 %v337_v5 }
  0x17   :  { %359 = vmatpush.bf16.msra.mxu2 %v337_v5  ;;  %360 = vmatpush.bf16.msra.mxu3 %v337_v5 }
  0x1a   :  { %152 = vmatpush.bf16.msra.mxu0 %v336_v6  ;;  %361 = vmatpush.bf16.msra.mxu1 %v336_v6 }
  0x1b   :  { %362 = vmatpush.bf16.msra.mxu2 %v336_v6  ;;  %363 = vmatpush.bf16.msra.mxu3 %v336_v6 }
  0x1e   :  { %153 = vmatpush.bf16.msra.mxu0 %v335_v7  ;;  %364 = vmatpush.bf16.msra.mxu1 %v335_v7 }
  0x1f   :  { %365 = vmatpush.bf16.msra.mxu2 %v335_v7  ;;  %366 = vmatpush.bf16.msra.mxu3 %v335_v7 }
  0x21   :  { %154 = vmatmul.bf16.vlgmr.msra.gmra.mxu0 %v327_v8  ;;  %164 = vmatmul.bf16.vlgmr.msra.gmra.mxu1 %v329_v9 }
  0x22   :  { %174 = vmatmul.bf16.vlgmr.msra.gmra.mxu2 %v331_v10  ;;  %184 = vmatmul.bf16.vlgmr.msra.gmra.mxu3 %v333_v11 }
  0x31   :  { %159 = vmatmul.bf16.gmra.mxu0 %v328_v12  ;;  %169 = vmatmul.bf16.gmra.mxu1 %v330_v13 }
  0x32   :  { %179 = vmatmul.bf16.gmra.mxu2 %v332_v14  ;;  %189 = vmatmul.bf16.gmra.mxu3 %v334_v15 }
  0x9e   :  { %v155_v17 = vpop.f32.mrf.mxu0  ;;  %v165_v18 = vpop.f32.mrf.mxu1 }
  0x9f   :  { %v156_v19 = vadd.f32 %v439_v16, %v155_v17  ;;  %v166_v20 = vadd.f32 %v439_v16, %v165_v18 }
  0xa1   :  { %vm195_vm0 = vcmp.ge.f32.partialorder %v156_v19, 0.0  ;;  %v211_v21 = vmul.f32 0.2, %v156_v19  ;;  %vm199_vm1 = vcmp.ge.f32.partialorder %v166_v20, 0.0  ;;  %v215_v22 = vmul.f32 0.2, %v166_v20 }
  0xa3   :  { %v227_v23 = vsel %vm195_vm0, %v156_v19, %v211_v21  ;;  %v231_v24 = vsel %vm199_vm1, %v166_v20, %v215_v22 }
  0xa4   :  { %243 = vst [vmem:[%s508_s3] sm:$0xff] %v227_v23 }
  0xa5   :  { %247 = vst [vmem:[%s508_s3 + $0x20] sm:$0xff] %v231_v24  ;;  %v175_v25 = vpop.f32.mrf.mxu2  ;;  %v185_v26 = vpop.f32.mrf.mxu3 }
  0xa6   :  { %v176_v27 = vadd.f32 %v439_v16, %v175_v25  ;;  %v186_v28 = vadd.f32 %v439_v16, %v185_v26  ;;  %v157_v29 = vpop.f32.mrf.mxu0  ;;  %v167_v30 = vpop.f32.mrf.mxu1 }
  0xa7   :  { %v158_v31 = vadd.f32 %v439_v16, %v157_v29  ;;  %v168_v32 = vadd.f32 %v439_v16, %v167_v30 }
  0xa8   :  { %vm203_vm2 = vcmp.ge.f32.partialorder %v176_v27, 0.0  ;;  %v219_v33 = vmul.f32 0.2, %v176_v27  ;;  %vm207_vm3 = vcmp.ge.f32.partialorder %v186_v28, 0.0  ;;  %v223_v34 = vmul.f32 0.2, %v186_v28 }
  0xa9   :  { %vm196_vm4 = vcmp.ge.f32.partialorder %v158_v31, 0.0  ;;  %v212_v35 = vmul.f32 0.2, %v158_v31  ;;  %vm200_vm5 = vcmp.ge.f32.partialorder %v168_v32, 0.0  ;;  %v216_v36 = vmul.f32 0.2, %v168_v32 }
  0xaa   :  { %v235_v37 = vsel %vm203_vm2, %v176_v27, %v219_v33  ;;  %v239_v38 = vsel %vm207_vm3, %v186_v28, %v223_v34 }
  0xab   :  { %251 = vst [vmem:[%s508_s3 + $0x40] sm:$0xff] %v235_v37  ;;  %v228_v39 = vsel %vm196_vm4, %v158_v31, %v212_v35  ;;  %v232_v40 = vsel %vm200_vm5, %v168_v32, %v216_v36 }
  0xac   :  { %255 = vst [vmem:[%s508_s3 + $0x60] sm:$0xff] %v239_v38 }
  0xad   :  { %244 = vst [vmem:[%s508_s3 + $0x8] sm:$0xff] %v228_v39  ;;  %v177_v41 = vpop.f32.mrf.mxu2  ;;  %v187_v42 = vpop.f32.mrf.mxu3 }
  0xae   :  { %248 = vst [vmem:[%s508_s3 + $0x28] sm:$0xff] %v232_v40  ;;  %v178_v43 = vadd.f32 %v439_v16, %v177_v41  ;;  %v188_v44 = vadd.f32 %v439_v16, %v187_v42  ;;  %v160_v45 = vpop.f32.mrf.mxu0  ;;  %v170_v46 = vpop.f32.mrf.mxu1 }
  0xaf   :  { %v161_v47 = vadd.f32 %v439_v16, %v160_v45  ;;  %v171_v48 = vadd.f32 %v439_v16, %v170_v46 }
  0xb0   :  { %vm204_vm6 = vcmp.ge.f32.partialorder %v178_v43, 0.0  ;;  %v220_v49 = vmul.f32 0.2, %v178_v43  ;;  %vm208_vm7 = vcmp.ge.f32.partialorder %v188_v44, 0.0  ;;  %v224_v50 = vmul.f32 0.2, %v188_v44 }
  0xb1   :  { %vm197_vm8 = vcmp.ge.f32.partialorder %v161_v47, 0.0  ;;  %v213_v51 = vmul.f32 0.2, %v161_v47  ;;  %vm201_vm9 = vcmp.ge.f32.partialorder %v171_v48, 0.0  ;;  %v217_v52 = vmul.f32 0.2, %v171_v48 }
  0xb2   :  { %v236_v53 = vsel %vm204_vm6, %v178_v43, %v220_v49  ;;  %v240_v54 = vsel %vm208_vm7, %v188_v44, %v224_v50 }
  0xb3   :  { %252 = vst [vmem:[%s508_s3 + $0x48] sm:$0xff] %v236_v53  ;;  %v229_v55 = vsel %vm197_vm8, %v161_v47, %v213_v51  ;;  %v233_v56 = vsel %vm201_vm9, %v171_v48, %v217_v52 }
  0xb4   :  { %256 = vst [vmem:[%s508_s3 + $0x68] sm:$0xff] %v240_v54 }
  0xb5   :  { %245 = vst [vmem:[%s508_s3 + $0x10] sm:$0xff] %v229_v55  ;;  %v180_v57 = vpop.f32.mrf.mxu2  ;;  %v190_v58 = vpop.f32.mrf.mxu3 }
  0xb6   :  { %249 = vst [vmem:[%s508_s3 + $0x30] sm:$0xff] %v233_v56  ;;  %v181_v59 = vadd.f32 %v439_v16, %v180_v57  ;;  %v191_v60 = vadd.f32 %v439_v16, %v190_v58  ;;  %v162_v61 = vpop.f32.mrf.mxu0  ;;  %v172_v62 = vpop.f32.mrf.mxu1 }
  0xb7   :  { %v163_v63 = vadd.f32 %v439_v16, %v162_v61  ;;  %v173_v0 = vadd.f32 %v439_v16, %v172_v62 }
  0xb8   :  { %vm205_vm10 = vcmp.ge.f32.partialorder %v181_v59, 0.0  ;;  %v221_v1 = vmul.f32 0.2, %v181_v59  ;;  %vm209_vm11 = vcmp.ge.f32.partialorder %v191_v60, 0.0  ;;  %v225_v2 = vmul.f32 0.2, %v191_v60 }
  0xb9   :  { %vm198_vm12 = vcmp.ge.f32.partialorder %v163_v63, 0.0  ;;  %v214_v3 = vmul.f32 0.2, %v163_v63  ;;  %vm202_vm13 = vcmp.ge.f32.partialorder %v173_v0, 0.0  ;;  %v218_v4 = vmul.f32 0.2, %v173_v0 }
  0xba   :  { %v237_v5 = vsel %vm205_vm10, %v181_v59, %v221_v1  ;;  %v241_v6 = vsel %vm209_vm11, %v191_v60, %v225_v2 }
  0xbb   :  { %253 = vst [vmem:[%s508_s3 + $0x50] sm:$0xff] %v237_v5  ;;  %v230_v7 = vsel %vm198_vm12, %v163_v63, %v214_v3  ;;  %v234_v8 = vsel %vm202_vm13, %v173_v0, %v218_v4 }
  0xbc   :  { %257 = vst [vmem:[%s508_s3 + $0x70] sm:$0xff] %v241_v6 }
  0xbd   :  { %246 = vst [vmem:[%s508_s3 + $0x18] sm:$0xff] %v230_v7  ;;  %v182_v9 = vpop.f32.mrf.mxu2  ;;  %v192_v10 = vpop.f32.mrf.mxu3 }
  0xbe   :  { %250 = vst [vmem:[%s508_s3 + $0x38] sm:$0xff] %v234_v8  ;;  %v183_v11 = vadd.f32 %v439_v16, %v182_v9  ;;  %v193_v12 = vadd.f32 %v439_v16, %v192_v10 }
  0xc0   :  { %vm206_vm14 = vcmp.ge.f32.partialorder %v183_v11, 0.0  ;;  %v222_v13 = vmul.f32 0.2, %v183_v11  ;;  %vm210_vm15 = vcmp.ge.f32.partialorder %v193_v12, 0.0  ;;  %v226_v14 = vmul.f32 0.2, %v193_v12 }
  0xc2   :  { %v238_v15 = vsel %vm206_vm14, %v183_v11, %v222_v13  ;;  %v242_v17 = vsel %vm210_vm15, %v193_v12, %v226_v14 }
  0xc3   :  { %254 = vst [vmem:[%s508_s3 + $0x58] sm:$0xff] %v238_v15 }
  0xc4   :  { %258 = vst [vmem:[%s508_s3 + $0x78] sm:$0xff] %v242_v17 }

// kernel: discriminator_forward.8
= control target key start
LH: loop header
LB: loop body
LE: loop exit
PB: predicated region body
PF: predicated region fallthrough
CT: control target
= control target key end

     0   :  { %s491_s12 = smov 0   ;;  %s493_s13 = smov 0   ;;  %s537_s0 = inlined_call_operand.vmem [shape: f32[2,16,128], index: 0, kind: input, shape index: {}]   ;;  %s538_s1 = inlined_call_operand.vmem [shape: f32[1,1,128], index: 1, kind: input, shape index: {}]   ;;  %s539_s2 = inlined_call_operand.vmem [shape: f32[1,1,128], index: 2, kind: input, shape index: {}]   ;;  %s540_s3 = inlined_call_operand.vmem [shape: f32[2,16,128], index: 3, kind: output, shape index: {}]  }
   0x1   :  { %s495_s14 = smov 0  }
   0x2 LB: > { %s25_s15 = sadd.s32 1, %s464_s13  ;;  %p406_p0 = scmp.ge.s32.totalorder %s468_s14, 1  ;;  %s468_s14 = sphi %s495_s14, %s13_s14   ;;  %s464_s13 = sphi %s493_s13, %s542_s13   ;;  %s460_s12 = sphi %s491_s12, %s541_s12  }
   0x3   : > { %p27_p1 = scmp.ge.s32.totalorder %s25_s15, 2  ;;  %p172_p2 = scmp.lt.s32.totalorder %s468_s14, 3 }
   0x5   : > { %s544_s15 = smov (%p27_p1, %s25_s15), 0  ;;  %p173_p3 = pnand %p406_p0, %p172_p2 }
   0x6   : > { %p208_p4 = scmp.lt.s32.totalorder (!%p173_p3), %s460_s12, 1 }
   0x7   : > { %176 = sbr.rel (%p173_p3) target bundleno = 83 (0x53), region = 32 }
   0xc   : > { %v470_v0 = vmov 16.0   ;;  %s546_s12 = smov (!%p208_p4, %s460_s12), 1  ;;  %v440_v36 = vld [vmem:[%s538_s1] ss:$0 sm:$0xff] }
   0xd   : > { %442 = vrcp.f32 %v470_v0  ;;  %s413_s16 = sshll.u32 %s546_s12, 4  ;;  %v441_v40 = vld [vmem:[%s539_s2] ss:$0 sm:$0xff] }
   0xe   : > { %s215_s19 = scalar_lea.vmem %s537_s0, %s413_s16  ;;  %s229_s26 = scalar_lea.vmem %s540_s3, %s413_s16 }
   0xf   : > { %v230_v1 = vld [vmem:[%s215_s19] sm:$0xff]  ;;  %v231_v2 = vld [vmem:[%s215_s19 + $0x8] sm:$0xff] }
  0x10   : > { %v232_v4 = vadd.f32 %v231_v2, %v230_v1 }
  0x12   : > { %v233_v6 = vrot.slane %v232_v4, 4 }
  0x13   : > { %v443_v3 = vpop.eup %442 }
  0x14   : > { %v240_v5 = vmul.f32 16.0, %v443_v3  ;;  %v234_v8 = vadd.f32 %v233_v6, %v232_v4  ;;  %vm244_vm0 = vweird.f32 %v443_v3 }
  0x16   : > { %v241_v7 = vsub.f32 1.0, %v240_v5  ;;  %v235_v10 = vrot.slane %v234_v8, 2 }
  0x18   : > { %v242_v9 = vmul.f32 %v443_v3, %v241_v7  ;;  %v236_v12 = vadd.f32 %v235_v10, %v234_v8 }
  0x1a   : > { %v243_v11 = vadd.f32 %v443_v3, %v242_v9  ;;  %v237_v13 = vrot.slane %v236_v12, 1 }
  0x1c   : > { %v245_v14 = vsel %vm244_vm0, %v443_v3, %v243_v11  ;;  %v238_v15 = vadd.f32 %v237_v13, %v236_v12 }
  0x1e   : > { %v246_v16 = vmul.f32 %v245_v14, %v238_v15 }
  0x20   : > { %v247_v17 = vsub.f32 %v230_v1, %v246_v16  ;;  %v248_v18 = vsub.f32 %v231_v2, %v246_v16 }
  0x22   : > { %v249_v19 = vmul.f32 %v247_v17, %v247_v17  ;;  %v250_v20 = vmul.f32 %v248_v18, %v248_v18 }
  0x24   : > { %v251_v21 = vadd.f32 %v250_v20, %v249_v19 }
  0x26   : > { %v252_v22 = vrot.slane %v251_v21, 4 }
  0x28   : > { %v253_v23 = vadd.f32 %v252_v22, %v251_v21 }
  0x2a   : > { %v254_v24 = vrot.slane %v253_v23, 2 }
  0x2c   : > { %v255_v25 = vadd.f32 %v254_v24, %v253_v23 }
  0x2e   : > { %v256_v26 = vrot.slane %v255_v25, 1 }
  0x30   : > { %v257_v27 = vadd.f32 %v256_v26, %v255_v25 }
  0x32   : > { %v258_v28 = vmul.f32 %v257_v27, %v245_v14 }
  0x34   : > { %v259_v29 = vadd.f32 1e-09, %v258_v28 }
  0x36   : > { %444 = vrsqrt.f32 %v259_v29  ;;  %vm266_vm1 = vweird.f32 %v259_v29 }
  0x3c   : > { %v445_v30 = vpop.eup %444 }
  0x3d   : > { %v261_v31 = vmul.f32 %v445_v30, %v259_v29  ;;  %vm267_vm2 = vweird.f32 %v445_v30 }
  0x3e   : > { %vm268_vm3 = vmor %vm266_vm1, %vm267_vm2 }
  0x3f   : > { %v262_v32 = vmul.f32 %v445_v30, %v261_v31 }
  0x41   : > { %v263_v33 = vmul.f32 0.5, %v262_v32 }
  0x43   : > { %v264_v34 = vsub.f32 1.5, %v263_v33 }
  0x45   : > { %v265_v35 = vmul.f32 %v445_v30, %v264_v34 }
  0x47   : > { %v269_v37 = vsel %vm268_vm3, %v445_v30, %v265_v35 }
  0x48   : > { %v270_v38 = vmul.f32 %v269_v37, %v247_v17  ;;  %v271_v39 = vmul.f32 %v269_v37, %v248_v18 }
  0x4a   : > { %v276_v41 = vmul.f32 %v440_v36, %v270_v38  ;;  %v277_v42 = vmul.f32 %v440_v36, %v271_v39 }
  0x4c   : > { %v282_v43 = vadd.f32 %v441_v40, %v276_v41  ;;  %v283_v44 = vadd.f32 %v441_v40, %v277_v42 }
  0x4e   : > { %vm284_vm4 = vcmp.ge.f32.partialorder %v282_v43, 0.0  ;;  %v286_v45 = vmul.f32 0.2, %v282_v43  ;;  %vm285_vm5 = vcmp.ge.f32.partialorder %v283_v44, 0.0  ;;  %v287_v46 = vmul.f32 0.2, %v283_v44 }
  0x50   : > { %v288_v47 = vsel %vm284_vm4, %v282_v43, %v286_v45  ;;  %v289_v48 = vsel %vm285_vm5, %v283_v44, %v287_v46 }
  0x51   : > { %290 = vst [vmem:[%s229_s26] sm:$0xff] %v288_v47 }
  0x52   : > { %291 = vst [vmem:[%s229_s26 + $0x8] sm:$0xff] %v289_v48 }
  0x53 PF: > { %s13_s14 = sadd.s32 1, %s468_s14   ;;  %s541_s12 = smov %s464_s13 }
  0x54   : > { %p10_p5 = scmp.ge.s32.totalorder %s13_s14, 4   ;;  %s542_s13 = smov %s544_s15 }
  0x56   :  { %12 = sbr.rel (!%p10_p5) target bundleno = 2 (0x2), region = 68 }

// kernel: discriminator_forward.7
= control target key start
LH: loop header
LB: loop body
LE: loop exit
PB: predicated region body
PF: predicated region fallthrough
CT: control target
= control target key end

     0   :  { %s249_s1 = inlined_call_operand.vmem [shape: bf16[128,128], index: 1, kind: input, shape index: {}]   ;;  %s250_s2 = inlined_call_operand.vmem [shape: f32[1,128], index: 2, kind: input, shape index: {}]   ;;  %s251_s0 = inlined_call_operand.vmem [shape: bf16[32,128], index: 0, kind: input, shape index: {}]   ;;  %s252_s3 = inlined_call_operand.vmem [shape: f32[32,128], index: 3, kind: output, shape index: {}]  }
   0x1   :  { %v174_v0 = vld [vmem:[%s249_s1 + $0x38] sm:$0xff]  ;;  %v173_v1 = vld [vmem:[%s249_s1 + $0x30] sm:$0xff]  ;;  %v172_v2 = vld [vmem:[%s249_s1 + $0x28] sm:$0xff] }
   0x2   :  { %98 = vmatpush.bf16.msra.mxu0 %v174_v0  ;;  %175 = vmatpush.bf16.msra.mxu1 %v174_v0  ;;  %v171_v3 = vld [vmem:[%s249_s1 + $0x20] sm:$0xff]  ;;  %v170_v4 = vld [vmem:[%s249_s1 + $0x18] sm:$0xff]  ;;  %v169_v5 = vld [vmem:[%s249_s1 + $0x10] sm:$0xff] }
   0x3   :  { %v168_v6 = vld [vmem:[%s249_s1 + $0x8] sm:$0xff]  ;;  %v167_v7 = vld [vmem:[%s249_s1] sm:$0xff] }
   0x4   :  { %v165_v8 = vld [vmem:[%s251_s0] sm:$0xff]  ;;  %v166_v9 = vld [vmem:[%s251_s0 + $0x8] sm:$0xff] }
   0x5   :  { %v183_v10 = vld [vmem:[%s250_s2] ss:$0 sm:$0xff] }
   0x6   :  { %99 = vmatpush.bf16.msra.mxu0 %v173_v1  ;;  %176 = vmatpush.bf16.msra.mxu1 %v173_v1 }
   0xa   :  { %100 = vmatpush.bf16.msra.mxu0 %v172_v2  ;;  %177 = vmatpush.bf16.msra.mxu1 %v172_v2 }
   0xe   :  { %101 = vmatpush.bf16.msra.mxu0 %v171_v3  ;;  %178 = vmatpush.bf16.msra.mxu1 %v171_v3 }
  0x12   :  { %102 = vmatpush.bf16.msra.mxu0 %v170_v4  ;;  %179 = vmatpush.bf16.msra.mxu1 %v170_v4 }
  0x16   :  { %103 = vmatpush.bf16.msra.mxu0 %v169_v5  ;;  %180 = vmatpush.bf16.msra.mxu1 %v169_v5 }
  0x1a   :  { %104 = vmatpush.bf16.msra.mxu0 %v168_v6  ;;  %181 = vmatpush.bf16.msra.mxu1 %v168_v6 }
  0x1e   :  { %105 = vmatpush.bf16.msra.mxu0 %v167_v7  ;;  %182 = vmatpush.bf16.msra.mxu1 %v167_v7 }
  0x21   :  { %106 = vmatmul.bf16.vlgmr.msra.gmra.mxu0 %v165_v8  ;;  %111 = vmatmul.bf16.vlgmr.msra.gmra.mxu1 %v166_v9 }
  0x9e   :  { %v107_v11 = vpop.f32.mrf.mxu0  ;;  %v112_v12 = vpop.f32.mrf.mxu1 }
  0x9f   :  { %v108_v13 = vadd.f32 %v183_v10, %v107_v11  ;;  %v113_v14 = vadd.f32 %v183_v10, %v112_v12 }
  0xa1   :  { %117 = vst [vmem:[%s252_s3] sm:$0xff] %v108_v13 }
  0xa2   :  { %119 = vst [vmem:[%s252_s3 + $0x10] sm:$0xff] %v113_v14 }
  0xa6   :  { %v109_v15 = vpop.f32.mrf.mxu0  ;;  %v114_v16 = vpop.f32.mrf.mxu1 }
  0xa7   :  { %v110_v17 = vadd.f32 %v183_v10, %v109_v15  ;;  %v115_v18 = vadd.f32 %v183_v10, %v114_v16 }
  0xa9   :  { %118 = vst [vmem:[%s252_s3 + $0x8] sm:$0xff] %v110_v17 }
  0xaa   :  { %120 = vst [vmem:[%s252_s3 + $0x18] sm:$0xff] %v115_v18 }

// kernel: discriminator_forward.9
= control target key start
LH: loop header
LB: loop body
LE: loop exit
PB: predicated region body
PF: predicated region fallthrough
CT: control target
= control target key end

     0   :  { %s440_s1 = inlined_call_operand.vmem [shape: bf16[256,128], index: 1, kind: input, shape index: {}]   ;;  %s441_s2 = inlined_call_operand.vmem [shape: f32[1,128], index: 2, kind: input, shape index: {}]   ;;  %s442_s0 = inlined_call_operand.vmem [shape: bf16[32,256], index: 0, kind: input, shape index: {}]   ;;  %s443_s3 = inlined_call_operand.vmem [shape: f32[32,128], index: 3, kind: output, shape index: {}]  }
   0x1   :  { %v307_v0 = vld [vmem:[%s440_s1 + $0x38] sm:$0xff]  ;;  %v306_v2 = vld [vmem:[%s440_s1 + $0x30] sm:$0xff]  ;;  %v305_v4 = vld [vmem:[%s440_s1 + $0x28] sm:$0xff] }
   0x2   :  { %v315_v1 = vld [vmem:[%s440_s1 + $0x78] sm:$0xff]  ;;  %170 = vmatpush.bf16.msra.mxu0 %v307_v0  ;;  %316 = vmatpush.bf16.msra.mxu2 %v307_v0  ;;  %v314_v3 = vld [vmem:[%s440_s1 + $0x70] sm:$0xff]  ;;  %v313_v5 = vld [vmem:[%s440_s1 + $0x68] sm:$0xff] }
   0x3   :  { %189 = vmatpush.bf16.msra.mxu1 %v315_v1  ;;  %324 = vmatpush.bf16.msra.mxu3 %v315_v1  ;;  %v304_v6 = vld [vmem:[%s440_s1 + $0x20] sm:$0xff]  ;;  %v303_v8 = vld [vmem:[%s440_s1 + $0x18] sm:$0xff]  ;;  %v302_v10 = vld [vmem:[%s440_s1 + $0x10] sm:$0xff] }
   0x4   :  { %v312_v7 = vld [vmem:[%s440_s1 + $0x60] sm:$0xff]  ;;  %v311_v9 = vld [vmem:[%s440_s1 + $0x58] sm:$0xff]  ;;  %v310_v11 = vld [vmem:[%s440_s1 + $0x50] sm:$0xff] }
   0x5   :  { %v301_v12 = vld [vmem:[%s440_s1 + $0x8] sm:$0xff]  ;;  %v300_v14 = vld [vmem:[%s440_s1] sm:$0xff]  ;;  %v226_v18 = vld [vmem:[%s442_s0 + $0x10] sm:$0xf] }
   0x6   :  { %171 = vmatpush.bf16.msra.mxu0 %v306_v2  ;;  %317 = vmatpush.bf16.msra.mxu2 %v306_v2  ;;  %v309_v13 = vld [vmem:[%s440_s1 + $0x48] sm:$0xff]  ;;  %v308_v15 = vld [vmem:[%s440_s1 + $0x40] sm:$0xff]  ;;  %v299_v19 = vld [vmem:[%s442_s0 + $0x14] sm:$0xf0] }
   0x7   :  { %190 = vmatpush.bf16.msra.mxu1 %v314_v3  ;;  %325 = vmatpush.bf16.msra.mxu3 %v314_v3  ;;  %v218_v16 = vld [vmem:[%s442_s0] sm:$0xf]  ;;  %v297_v17 = vld [vmem:[%s442_s0 + $0x4] sm:$0xf0]  ;;  %v296_v20 = vld [vmem:[%s442_s0 + $0x4] sm:$0xf]  ;;  %v227_v25 = vor.u32 %v299_v19, %v226_v18 }
   0x8   :  { %v220_v21 = vld [vmem:[%s442_s0 + $0x8] sm:$0xf0]  ;;  %v298_v22 = vld [vmem:[%s442_s0 + $0x14] sm:$0xf]  ;;  %v228_v23 = vld [vmem:[%s442_s0 + $0x18] sm:$0xf0]  ;;  %v219_v24 = vor.u32 %v297_v17, %v218_v16 }
   0x9   :  { %v223_v26 = vor.u32 %v296_v20, %v220_v21  ;;  %v231_v27 = vor.u32 %v298_v22, %v228_v23  ;;  %v332_v28 = vld [vmem:[%s441_s2] ss:$0 sm:$0xff] }
   0xa   :  { %172 = vmatpush.bf16.msra.mxu0 %v305_v4  ;;  %318 = vmatpush.bf16.msra.mxu2 %v305_v4 }
   0xb   :  { %191 = vmatpush.bf16.msra.mxu1 %v313_v5  ;;  %326 = vmatpush.bf16.msra.mxu3 %v313_v5 }
   0xe   :  { %173 = vmatpush.bf16.msra.mxu0 %v304_v6  ;;  %319 = vmatpush.bf16.msra.mxu2 %v304_v6 }
   0xf   :  { %192 = vmatpush.bf16.msra.mxu1 %v312_v7  ;;  %327 = vmatpush.bf16.msra.mxu3 %v312_v7 }
  0x12   :  { %174 = vmatpush.bf16.msra.mxu0 %v303_v8  ;;  %320 = vmatpush.bf16.msra.mxu2 %v303_v8 }
  0x13   :  { %193 = vmatpush.bf16.msra.mxu1 %v311_v9  ;;  %328 = vmatpush.bf16.msra.mxu3 %v311_v9 }
  0x16   :  { %175 = vmatpush.bf16.msra.mxu0 %v302_v10  ;;  %321 = vmatpush.bf16.msra.mxu2 %v302_v10 }
  0x17   :  { %194 = vmatpush.bf16.msra.mxu1 %v310_v11  ;;  %329 = vmatpush.bf16.msra.mxu3 %v310_v11 }
  0x1a   :  { %176 = vmatpush.bf16.msra.mxu0 %v301_v12  ;;  %322 = vmatpush.bf16.msra.mxu2 %v301_v12 }
  0x1b   :  { %195 = vmatpush.bf16.msra.mxu1 %v309_v13  ;;  %330 = vmatpush.bf16.msra.mxu3 %v309_v13 }
  0x1e   :  { %177 = vmatpush.bf16.msra.mxu0 %v300_v14  ;;  %323 = vmatpush.bf16.msra.mxu2 %v300_v14 }
  0x1f   :  { %196 = vmatpush.bf16.msra.mxu1 %v308_v15  ;;  %331 = vmatpush.bf16.msra.mxu3 %v308_v15 }
  0x21   :  { %178 = vmatmul.bf16.vlgmr.msra.gmra.mxu0 %v219_v24  ;;  %183 = vmatmul.bf16.vlgmr.msra.gmra.mxu2 %v227_v25 }
  0x22   :  { %197 = vmatmul.bf16.vlgmr.msra.gmra.mxu1 %v223_v26  ;;  %202 = vmatmul.bf16.vlgmr.msra.gmra.mxu3 %v231_v27 }
  0x9e   :  { %v179_v29 = vpop.f32.mrf.mxu0 }
  0x9f   :  { %v180_v30 = vadd.f32 %v332_v28, %v179_v29  ;;  %v198_v31 = vpop.f32.mrf.mxu1 }
  0xa1   :  { %v199_v32 = vadd.f32 %v198_v31, %v180_v30 }
  0xa3   :  { %208 = vst [vmem:[%s443_s3] sm:$0xff] %v199_v32 }
  0xa4   :  { %v184_v33 = vpop.f32.mrf.mxu2 }
  0xa5   :  { %v185_v34 = vadd.f32 %v332_v28, %v184_v33  ;;  %v203_v35 = vpop.f32.mrf.mxu3 }
  0xa6   :  { %v181_v36 = vpop.f32.mrf.mxu0 }
  0xa7   :  { %v204_v37 = vadd.f32 %v203_v35, %v185_v34  ;;  %v182_v38 = vadd.f32 %v332_v28, %v181_v36  ;;  %v200_v39 = vpop.f32.mrf.mxu1 }
  0xa9   :  { %210 = vst [vmem:[%s443_s3 + $0x10] sm:$0xff] %v204_v37  ;;  %v201_v40 = vadd.f32 %v200_v39, %v182_v38 }
  0xab   :  { %209 = vst [vmem:[%s443_s3 + $0x8] sm:$0xff] %v201_v40 }
  0xac   :  { %v186_v41 = vpop.f32.mrf.mxu2 }
  0xad   :  { %v187_v42 = vadd.f32 %v332_v28, %v186_v41  ;;  %v205_v43 = vpop.f32.mrf.mxu3 }
  0xaf   :  { %v206_v44 = vadd.f32 %v205_v43, %v187_v42 }
  0xb1   :  { %211 = vst [vmem:[%s443_s3 + $0x18] sm:$0xff] %v206_v44 }

// kernel: discriminator_forward.10
= control target key start
LH: loop header
LB: loop body
LE: loop exit
PB: predicated region body
PF: predicated region fallthrough
CT: control target
= control target key end

     0   :  { %s494_s12 = smov 0   ;;  %s496_s13 = smov 0   ;;  %s542_s0 = inlined_call_operand.vmem [shape: f32[2,9,128], index: 0, kind: input, shape index: {}]   ;;  %s543_s1 = inlined_call_operand.vmem [shape: f32[1,1,128], index: 1, kind: input, shape index: {}]   ;;  %s544_s2 = inlined_call_operand.vmem [shape: f32[1,1,128], index: 2, kind: input, shape index: {}]   ;;  %s545_s3 = inlined_call_operand.vmem [shape: f32[2,9,128], index: 3, kind: output, shape index: {}]  }
   0x1   :  { %s498_s14 = smov 0  }
   0x2 LB: > { %s25_s15 = sadd.s32 1, %s467_s13  ;;  %p409_p0 = scmp.ge.s32.totalorder %s471_s14, 1  ;;  %s471_s14 = sphi %s498_s14, %s13_s14   ;;  %s467_s13 = sphi %s496_s13, %s547_s13   ;;  %s463_s12 = sphi %s494_s12, %s546_s12  }
   0x3   : > { %p27_p1 = scmp.ge.s32.totalorder %s25_s15, 2  ;;  %p172_p2 = scmp.lt.s32.totalorder %s471_s14, 3 }
   0x5   : > { %s549_s15 = smov (%p27_p1, %s25_s15), 0  ;;  %p173_p3 = pnand %p409_p0, %p172_p2 }
   0x6   : > { %p208_p4 = scmp.lt.s32.totalorder (!%p173_p3), %s463_s12, 1 }
   0x7   : > { %176 = sbr.rel (%p173_p3) target bundleno = 85 (0x55), region = 32 }
   0xc   : > { %v473_v0 = vmov 9.0   ;;  %s551_s12 = smov (!%p208_p4, %s463_s12), 1  ;;  %vm232_vm0 = vcmask 1040384   ;;  %v443_v38 = vld [vmem:[%s543_s1] ss:$0 sm:$0xff] }
   0xd   : > { %445 = vrcp.f32 %v473_v0  ;;  %s416_s16 = sshll.u32 %s551_s12, 4  ;;  %v444_v42 = vld [vmem:[%s544_s2] ss:$0 sm:$0xff] }
   0xe   : > { %s215_s19 = scalar_lea.vmem %s542_s0, %s416_s16  ;;  %s229_s26 = scalar_lea.vmem %s545_s3, %s416_s16 }
   0xf   : > { %v230_v1 = vld [vmem:[%s215_s19] sm:$0xff]  ;;  %v231_v2 = vld [vmem:[%s215_s19 + $0x8] sm:$0x1] }
  0x10   : > { %v233_v4 = vsel %vm232_vm0, %v231_v2, 0.0 }
  0x11   : > { %v234_v5 = vadd.f32 %v233_v4, %v230_v1 }
  0x13   : > { %v446_v3 = vpop.eup %445  ;;  %v235_v7 = vrot.slane %v234_v5, 4 }
  0x14   : > { %v242_v6 = vmul.f32 9.0, %v446_v3  ;;  %vm246_vm1 = vweird.f32 %v446_v3 }
  0x15   : > { %v236_v9 = vadd.f32 %v235_v7, %v234_v5 }
  0x16   : > { %v243_v8 = vsub.f32 1.0, %v242_v6 }
  0x17   : > { %v237_v11 = vrot.slane %v236_v9, 2 }
  0x18   : > { %v244_v10 = vmul.f32 %v446_v3, %v243_v8 }
  0x19   : > { %v238_v13 = vadd.f32 %v237_v11, %v236_v9 }
  0x1a   : > { %v245_v12 = vadd.f32 %v446_v3, %v244_v10 }
  0x1b   : > { %v239_v14 = vrot.slane %v238_v13, 1 }
  0x1c   : > { %v247_v15 = vsel %vm246_vm1, %v446_v3, %v245_v12 }
  0x1d   : > { %v240_v16 = vadd.f32 %v239_v14, %v238_v13 }
  0x1f   : > { %v248_v17 = vmul.f32 %v247_v15, %v240_v16 }
  0x21   : > { %v249_v18 = vsub.f32 %v230_v1, %v248_v17  ;;  %v250_v19 = vsub.f32 %v231_v2, %v248_v17 }
  0x23   : > { %v251_v20 = vmul.f32 %v249_v18, %v249_v18  ;;  %v252_v21 = vmul.f32 %v250_v19, %v250_v19 }
  0x25   : > { %v253_v22 = vsel %vm232_vm0, %v252_v21, 0.0 }
  0x26   : > { %v254_v23 = vadd.f32 %v253_v22, %v251_v20 }
  0x28   : > { %v255_v24 = vrot.slane %v254_v23, 4 }
  0x2a   : > { %v256_v25 = vadd.f32 %v255_v24, %v254_v23 }
  0x2c   : > { %v257_v26 = vrot.slane %v256_v25, 2 }
  0x2e   : > { %v258_v27 = vadd.f32 %v257_v26, %v256_v25 }
  0x30   : > { %v259_v28 = vrot.slane %v258_v27, 1 }
  0x32   : > { %v260_v29 = vadd.f32 %v259_v28, %v258_v27 }
  0x34   : > { %v261_v30 = vmul.f32 %v260_v29, %v247_v15 }
  0x36   : > { %v262_v31 = vadd.f32 1e-09, %v261_v30 }
  0x38   : > { %447 = vrsqrt.f32 %v262_v31  ;;  %vm269_vm2 = vweird.f32 %v262_v31 }
  0x3e   : > { %v448_v32 = vpop.eup %447 }
  0x3f   : > { %v264_v33 = vmul.f32 %v448_v32, %v262_v31  ;;  %vm270_vm3 = vweird.f32 %v448_v32 }
  0x40   : > { %vm271_vm4 = vmor %vm269_vm2, %vm270_vm3 }
  0x41   : > { %v265_v34 = vmul.f32 %v448_v32, %v264_v33 }
  0x43   : > { %v266_v35 = vmul.f32 0.5, %v265_v34 }
  0x45   : > { %v267_v36 = vsub.f32 1.5, %v266_v35 }
  0x47   : > { %v268_v37 = vmul.f32 %v448_v32, %v267_v36 }
  0x49   : > { %v272_v39 = vsel %vm271_vm4, %v448_v32, %v268_v37 }
  0x4a   : > { %v273_v40 = vmul.f32 %v272_v39, %v249_v18  ;;  %v274_v41 = vmul.f32 %v272_v39, %v250_v19 }
  0x4c   : > { %v279_v43 = vmul.f32 %v443_v38, %v273_v40  ;;  %v280_v44 = vmul.f32 %v443_v38, %v274_v41 }
  0x4e   : > { %v285_v45 = vadd.f32 %v444_v42, %v279_v43  ;;  %v286_v46 = vadd.f32 %v444_v42, %v280_v44 }
  0x50   : > { %vm287_vm5 = vcmp.ge.f32.partialorder %v285_v45, 0.0  ;;  %v289_v47 = vmul.f32 0.2, %v285_v45  ;;  %vm288_vm6 = vcmp.ge.f32.partialorder %v286_v46, 0.0  ;;  %v290_v48 = vmul.f32 0.2, %v286_v46 }
  0x52   : > { %v291_v49 = vsel %vm287_vm5, %v285_v45, %v289_v47  ;;  %v292_v50 = vsel %vm288_vm6, %v286_v46, %v290_v48 }
  0x53   : > { %293 = vst [vmem:[%s229_s26] sm:$0xff] %v291_v49 }
  0x54   : > { %294 = vst [vmem:[%s229_s26 + $0x8] sm:$0x1] %v292_v50 }
  0x55 PF: > { %s13_s14 = sadd.s32 1, %s471_s14   ;;  %s546_s12 = smov %s467_s13 }
  0x56   : > { %p10_p5 = scmp.ge.s32.totalorder %s13_s14, 4   ;;  %s547_s13 = smov %s549_s15 }
  0x58   :  { %12 = sbr.rel (!%p10_p5) target bundleno = 2 (0x2), region = 68 }

// kernel: discriminator_forward.11
= control target key start
LH: loop header
LB: loop body
LE: loop exit
PB: predicated region body
PF: predicated region fallthrough
CT: control target
= control target key end

     0   :  { %s738_s1 = inlined_call_operand.vmem [shape: bf16[512,128], index: 1, kind: input, shape index: {}]   ;;  %s739_s2 = inlined_call_operand.vmem [shape: f32[1,128], index: 2, kind: input, shape index: {}]   ;;  %s740_s0 = inlined_call_operand.vmem [shape: bf16[16,512], index: 0, kind: input, shape index: {}]   ;;  %s741_s3 = inlined_call_operand.vmem [shape: f32[16,128], index: 3, kind: output, shape index: {}]  }
   0x1   :  { %v555_v0 = vld [vmem:[%s738_s1 + $0x38] sm:$0xff]  ;;  %v554_v4 = vld [vmem:[%s738_s1 + $0x30] sm:$0xff]  ;;  %v553_v8 = vld [vmem:[%s738_s1 + $0x28] sm:$0xff] }
   0x2   :  { %v563_v1 = vld [vmem:[%s738_s1 + $0x78] sm:$0xff]  ;;  %298 = vmatpush.bf16.msra.mxu0 %v555_v0  ;;  %v562_v5 = vld [vmem:[%s738_s1 + $0x70] sm:$0xff]  ;;  %v561_v9 = vld [vmem:[%s738_s1 + $0x68] sm:$0xff] }
   0x3   :  { %v571_v2 = vld [vmem:[%s738_s1 + $0xb8] sm:$0xff]  ;;  %312 = vmatpush.bf16.msra.mxu1 %v563_v1  ;;  %v570_v6 = vld [vmem:[%s738_s1 + $0xb0] sm:$0xff]  ;;  %v569_v10 = vld [vmem:[%s738_s1 + $0xa8] sm:$0xff] }
   0x4   :  { %v579_v3 = vld [vmem:[%s738_s1 + $0xf8] sm:$0xff]  ;;  %326 = vmatpush.bf16.msra.mxu2 %v571_v2  ;;  %v578_v7 = vld [vmem:[%s738_s1 + $0xf0] sm:$0xff]  ;;  %v577_v11 = vld [vmem:[%s738_s1 + $0xe8] sm:$0xff] }
   0x5   :  { %340 = vmatpush.bf16.msra.mxu3 %v579_v3  ;;  %v552_v12 = vld [vmem:[%s738_s1 + $0x20] sm:$0xff]  ;;  %v551_v16 = vld [vmem:[%s738_s1 + $0x18] sm:$0xff]  ;;  %v550_v20 = vld [vmem:[%s738_s1 + $0x10] sm:$0xff] }
   0x6   :  { %299 = vmatpush.bf16.msra.mxu0 %v554_v4  ;;  %v560_v13 = vld [vmem:[%s738_s1 + $0x60] sm:$0xff]  ;;  %v559_v17 = vld [vmem:[%s738_s1 + $0x58] sm:$0xff]  ;;  %v558_v21 = vld [vmem:[%s738_s1 + $0x50] sm:$0xff] }
   0x7   :  { %313 = vmatpush.bf16.msra.mxu1 %v562_v5  ;;  %v568_v14 = vld [vmem:[%s738_s1 + $0xa0] sm:$0xff]  ;;  %v567_v18 = vld [vmem:[%s738_s1 + $0x98] sm:$0xff]  ;;  %v566_v22 = vld [vmem:[%s738_s1 + $0x90] sm:$0xff] }
   0x8   :  { %327 = vmatpush.bf16.msra.mxu2 %v570_v6  ;;  %v576_v15 = vld [vmem:[%s738_s1 + $0xe0] sm:$0xff]  ;;  %v575_v19 = vld [vmem:[%s738_s1 + $0xd8] sm:$0xff]  ;;  %v574_v23 = vld [vmem:[%s738_s1 + $0xd0] sm:$0xff] }
   0x9   :  { %341 = vmatpush.bf16.msra.mxu3 %v578_v7  ;;  %v549_v24 = vld [vmem:[%s738_s1 + $0x8] sm:$0xff]  ;;  %v548_v28 = vld [vmem:[%s738_s1] sm:$0xff]  ;;  %v546_v33 = vld [vmem:[%s740_s0 + $0xc] sm:$0xf0] }
   0xa   :  { %300 = vmatpush.bf16.msra.mxu0 %v553_v8  ;;  %v557_v25 = vld [vmem:[%s738_s1 + $0x48] sm:$0xff]  ;;  %v556_v29 = vld [vmem:[%s738_s1 + $0x40] sm:$0xff]  ;;  %v402_v35 = vld [vmem:[%s740_s0 + $0x10] sm:$0xf0] }
   0xb   :  { %314 = vmatpush.bf16.msra.mxu1 %v561_v9  ;;  %v565_v26 = vld [vmem:[%s738_s1 + $0x88] sm:$0xff]  ;;  %v564_v30 = vld [vmem:[%s738_s1 + $0x80] sm:$0xff]  ;;  %v547_v37 = vld [vmem:[%s740_s0 + $0x14] sm:$0xf0] }
   0xc   :  { %328 = vmatpush.bf16.msra.mxu2 %v569_v10  ;;  %v573_v27 = vld [vmem:[%s738_s1 + $0xc8] sm:$0xff]  ;;  %v572_v31 = vld [vmem:[%s738_s1 + $0xc0] sm:$0xff]  ;;  %v410_v39 = vld [vmem:[%s740_s0 + $0x18] sm:$0xf0] }
   0xd   :  { %342 = vmatpush.bf16.msra.mxu3 %v577_v11  ;;  %v400_v32 = vld [vmem:[%s740_s0] sm:$0xf]  ;;  %v544_v34 = vld [vmem:[%s740_s0 + $0x4] sm:$0xf]  ;;  %v408_v36 = vld [vmem:[%s740_s0 + $0x8] sm:$0xf] }
   0xe   :  { %301 = vmatpush.bf16.msra.mxu0 %v552_v12  ;;  %v545_v38 = vld [vmem:[%s740_s0 + $0xc] sm:$0xf]  ;;  %v401_v40 = vor.u32 %v546_v33, %v400_v32  ;;  %v405_v41 = vor.u32 %v544_v34, %v402_v35  ;;  %v409_v42 = vor.u32 %v547_v37, %v408_v36  ;;  %v580_v44 = vld [vmem:[%s739_s2] ss:$0 sm:$0xff] }
   0xf   :  { %315 = vmatpush.bf16.msra.mxu1 %v560_v13  ;;  %v413_v43 = vor.u32 %v545_v38, %v410_v39 }
  0x10   :  { %329 = vmatpush.bf16.msra.mxu2 %v568_v14 }
  0x11   :  { %343 = vmatpush.bf16.msra.mxu3 %v576_v15 }
  0x12   :  { %302 = vmatpush.bf16.msra.mxu0 %v551_v16 }
  0x13   :  { %316 = vmatpush.bf16.msra.mxu1 %v559_v17 }
  0x14   :  { %330 = vmatpush.bf16.msra.mxu2 %v567_v18 }
  0x15   :  { %344 = vmatpush.bf16.msra.mxu3 %v575_v19 }
  0x16   :  { %303 = vmatpush.bf16.msra.mxu0 %v550_v20 }
  0x17   :  { %317 = vmatpush.bf16.msra.mxu1 %v558_v21 }
  0x18   :  { %331 = vmatpush.bf16.msra.mxu2 %v566_v22 }
  0x19   :  { %345 = vmatpush.bf16.msra.mxu3 %v574_v23 }
  0x1a   :  { %304 = vmatpush.bf16.msra.mxu0 %v549_v24 }
  0x1b   :  { %318 = vmatpush.bf16.msra.mxu1 %v557_v25 }
  0x1c   :  { %332 = vmatpush.bf16.msra.mxu2 %v565_v26 }
  0x1d   :  { %346 = vmatpush.bf16.msra.mxu3 %v573_v27 }
  0x1e   :  { %305 = vmatpush.bf16.msra.mxu0 %v548_v28 }
  0x1f   :  { %319 = vmatpush.bf16.msra.mxu1 %v556_v29 }
  0x20   :  { %333 = vmatpush.bf16.msra.mxu2 %v564_v30 }
  0x21   :  { %347 = vmatpush.bf16.msra.mxu3 %v572_v31  ;;  %306 = vmatmul.bf16.vlgmr.msra.gmra.mxu0 %v401_v40 }
  0x22   :  { %320 = vmatmul.bf16.vlgmr.msra.gmra.mxu1 %v405_v41 }
  0x23   :  { %334 = vmatmul.bf16.vlgmr.msra.gmra.mxu2 %v409_v42 }
  0x24   :  { %348 = vmatmul.bf16.vlgmr.msra.gmra.mxu3 %v413_v43 }
  0x9e   :  { %v307_v45 = vpop.f32.mrf.mxu0 }
  0x9f   :  { %v308_v46 = vadd.f32 %v580_v44, %v307_v45  ;;  %v321_v47 = vpop.f32.mrf.mxu1 }
  0xa1   :  { %v322_v48 = vadd.f32 %v321_v47, %v308_v46 }
  0xa6   :  { %v335_v49 = vpop.f32.mrf.mxu2  ;;  %v309_v52 = vpop.f32.mrf.mxu0 }
  0xa7   :  { %v349_v50 = vpop.f32.mrf.mxu3  ;;  %v336_v51 = vadd.f32 %v335_v49, %v322_v48  ;;  %v310_v54 = vadd.f32 %v580_v44, %v309_v52  ;;  %v323_v56 = vpop.f32.mrf.mxu1 }
  0xa9   :  { %v350_v53 = vadd.f32 %v349_v50, %v336_v51  ;;  %v324_v57 = vadd.f32 %v323_v56, %v310_v54 }
  0xab   :  { %v542_v55 = vmul.f32 -1.442695, %v350_v53 }
  0xad   :  { %581 = vpow2.f32 %v542_v55 }
  0xae   :  { %v337_v58 = vpop.f32.mrf.mxu2 }
  0xaf   :  { %v338_v59 = vadd.f32 %v337_v58, %v324_v57  ;;  %v351_v60 = vpop.f32.mrf.mxu3 }
  0xb1   :  { %v352_v61 = vadd.f32 %v351_v60, %v338_v59 }
  0xb3   :  { %v582_v62 = vpop.eup %581  ;;  %v543_v63 = vmul.f32 -1.442695, %v352_v61 }
  0xb4   :  { %v360_v0 = vadd.f32 1.0, %v582_v62 }
  0xb5   :  { %583 = vpow2.f32 %v543_v63 }
  0xb6   :  { %585 = vrcp.f32 %v360_v0  ;;  %v373_v6 = vand.u32 2147483648, %v360_v0  ;;  %v371_v8 = vand.u32 2147483647, %v360_v0  ;;  %vm367_vm1 = vweird.f32 %v360_v0 }
  0xb8   :  { %v374_v11 = vor.u32 1.1754944e-38, %v373_v6  ;;  %vm372_vm3 = vcmp.eq.f32.partialorder %v371_v8, 8.507059e+37 }
  0xbb   :  { %v584_v1 = vpop.eup %583 }
  0xbc   :  { %v586_v2 = vpop.eup %585  ;;  %v361_v3 = vadd.f32 1.0, %v584_v1 }
  0xbd   :  { %v363_v4 = vmul.f32 %v586_v2, %v360_v0  ;;  %vm368_vm0 = vweird.f32 %v586_v2 }
  0xbe   :  { %587 = vrcp.f32 %v361_v3  ;;  %vm369_vm2 = vmor %vm367_vm1, %vm368_vm0  ;;  %v388_v16 = vand.u32 2147483648, %v361_v3  ;;  %v386_v18 = vand.u32 2147483647, %v361_v3  ;;  %vm382_vm5 = vweird.f32 %v361_v3 }
  0xbf   :  { %v364_v5 = vsub.f32 1.0, %v363_v4 }
  0xc0   :  { %v389_v20 = vor.u32 1.1754944e-38, %v388_v16  ;;  %vm387_vm7 = vcmp.eq.f32.partialorder %v386_v18, 8.507059e+37 }
  0xc1   :  { %v365_v7 = vmul.f32 %v586_v2, %v364_v5 }
  0xc3   :  { %v366_v9 = vadd.f32 %v586_v2, %v365_v7 }
  0xc4   :  { %v588_v10 = vpop.eup %587 }
  0xc5   :  { %v370_v12 = vsel %vm369_vm2, %v586_v2, %v366_v9  ;;  %v378_v13 = vmul.f32 %v588_v10, %v361_v3  ;;  %vm383_vm4 = vweird.f32 %v588_v10 }
  0xc6   :  { %v375_v14 = vsel %vm372_vm3, %v374_v11, %v370_v12  ;;  %vm384_vm6 = vmor %vm382_vm5, %vm383_vm4 }
  0xc7   :  { %392 = vst [vmem:[%s741_s3] sm:$0xff] %v375_v14  ;;  %v379_v15 = vsub.f32 1.0, %v378_v13 }
  0xc9   :  { %v380_v17 = vmul.f32 %v588_v10, %v379_v15 }
  0xcb   :  { %v381_v19 = vadd.f32 %v588_v10, %v380_v17 }
  0xcd   :  { %v385_v21 = vsel %vm384_vm6, %v588_v10, %v381_v19 }
  0xce   :  { %v390_v22 = vsel %vm387_vm7, %v389_v20, %v385_v21 }
  0xcf   :  { %393 = vst [vmem:[%s741_s3 + $0x8] sm:$0xff] %v390_v22 }

</bundles_post_ra>
